<compile_context>
chip_gen: v7x
topology: tpu7x:2x2x1
jax: 0.10.0
libtpu: 0.0.40
codegen_flags: <defaults>
</compile_context>

<pallas_src>
import jax
import jax.numpy as jnp
from jax.experimental import pallas as pl
from jax.experimental.pallas import tpu as pltpu


LANES = 128            # lane width (last dim of every vreg)
SUBLANES = 8           # f32 sublane count per vreg
MAX_BLOCK_ROWS = 1024  # 1024 x 128 f32 = 512 KiB per input per grid step


def _weighted_mse_partial_kernel(x_ref, y_ref, o_ref):
    """One grid step: partial sum of squared errors for this block.

    x_ref/y_ref: (block_rows, 128) in the caller's dtype (upcast in-register).
    o_ref:       (8, 128) f32 partial-sum tile, unique per grid step (no carry).
    """
    d = x_ref[...].astype(jnp.float32) - y_ref[...].astype(jnp.float32)
    sq = d * d
    # Fold groups of 8 rows (one vreg sublane group each) down to a single (8,128)
    # vreg: pure VPU adds, no cross-lane XLU reduce, no scalar dependency chain.
    o_ref[...] = sq.reshape(-1, SUBLANES, LANES).sum(axis=0)


def weighted_mse_loss(x, y, weight=0.5):
    """weight * mean((x - y)**2), matching WeightedLoss(nn.MSELoss(), weight)."""
    assert x.shape == y.shape
    n_elems = x.size
    w_over_n = float(weight) / float(n_elems)

    # Flatten (layout-agnostic for a full elementwise + global-reduction loss).
    flat_x = x.reshape(-1)
    flat_y = y.reshape(-1)

    # Choose the block: as large as possible up to MAX_BLOCK_ROWS, multiple of 8 rows.
    rows_needed = -(-n_elems // LANES)  # ceil
    if rows_needed <= MAX_BLOCK_ROWS:
        block_rows = max(SUBLANES, ((rows_needed + SUBLANES - 1) // SUBLANES) * SUBLANES)
    else:
        block_rows = MAX_BLOCK_ROWS
    block_elems = block_rows * LANES

    # Single fused zero-pad to a whole number of blocks (zeros in both x and y
    # contribute 0 to the SSE; the mean still divides by the original n_elems).
    num_blocks = -(-n_elems // block_elems)  # ceil
    total = num_blocks * block_elems
    pad = total - n_elems
    if pad:
        flat_x = jnp.pad(flat_x, (0, pad))
        flat_y = jnp.pad(flat_y, (0, pad))

    rows = total // LANES
    x2d = flat_x.reshape(rows, LANES)
    y2d = flat_y.reshape(rows, LANES)

    itemsize = jnp.dtype(x.dtype).itemsize
    cost = pl.CostEstimate(
        flops=3 * n_elems,                       # sub, mul, add-reduce
        transcendentals=0,
        bytes_accessed=2 * total * itemsize + num_blocks * SUBLANES * LANES * 4,
    )

    partials = pl.pallas_call(
        _weighted_mse_partial_kernel,
        out_shape=jax.ShapeDtypeStruct((num_blocks * SUBLANES, LANES), jnp.float32),
        grid_spec=pltpu.PrefetchScalarGridSpec(
            num_scalar_prefetch=0,
            grid=(num_blocks,),
            in_specs=[
                pl.BlockSpec((block_rows, LANES), lambda i: (i, 0)),
                pl.BlockSpec((block_rows, LANES), lambda i: (i, 0)),
            ],
            out_specs=pl.BlockSpec((SUBLANES, LANES), lambda i: (i, 0)),
        ),
        compiler_params=pltpu.CompilerParams(
            # No carried state across the grid -> fully parallel axis
            # (sharded across both TensorCores on v7x; neutral on v5e/v6e).
            dimension_semantics=("parallel",),
        ),
        cost_estimate=cost,
    )(x2d, y2d)

    # Tiny final reduction + mean + scalar weight in plain JAX.
    return w_over_n * jnp.sum(partials)


if __name__ == "__main__":
    key = jax.random.PRNGKey(0)
    kx, ky = jax.random.split(key)

    # Small NCHW inputs consistent with an image-style loss.
    x = jax.random.normal(kx, (2, 4, 16, 16), dtype=jnp.float32)
    y = jax.random.normal(ky, (2, 4, 16, 16), dtype=jnp.float32)

    weight = 0.5  # deterministic module "parameter" (WeightedLoss.weight)

    out = weighted_mse_loss(x, y, weight=weight)
    out = jax.block_until_ready(out)

    # Reference check against plain JAX (== weight * MSELoss(reduction='mean')).
    ref = weight * jnp.mean((x - y) ** 2)
    assert jnp.allclose(out, ref, rtol=1e-5, atol=1e-6), (out, ref)

    print("KERNEL_OK")
</pallas_src>

<mosaic_0001>
module attributes {stable_mosaic.version = 11 : i64} {
  func.func @_weighted_mse_partial_kernel(%arg0: i32, %arg1: memref<16x128xf32, #tpu.memory_space<vmem>>, %arg2: memref<16x128xf32, #tpu.memory_space<vmem>>, %arg3: memref<8x128xf32, #tpu.memory_space<vmem>>) attributes {dimension_semantics = [#tpu.dimension_semantics<parallel>], iteration_bounds = array<i64: 1>, scalar_prefetch = 0 : i64, scratch_operands = 0 : i64, tpu.core_type = #tpu.core_type<tc>, window_params = [{transform_indices = @transform_0, window_bounds = array<i64: 16, 128>}, {transform_indices = @transform_1, window_bounds = array<i64: 16, 128>}, {transform_indices = @transform_2, window_bounds = array<i64: 8, 128>}]} {
    %c0 = arith.constant 0 : index
    %c0_0 = arith.constant 0 : index
    %0 = vector.load %arg1[%c0, %c0_0] : memref<16x128xf32, #tpu.memory_space<vmem>>, vector<16x128xf32>
    %c0_1 = arith.constant 0 : index
    %c0_2 = arith.constant 0 : index
    %1 = vector.load %arg2[%c0_1, %c0_2] : memref<16x128xf32, #tpu.memory_space<vmem>>, vector<16x128xf32>
    %2 = arith.subf %0, %1 : vector<16x128xf32>
    %3 = arith.mulf %2, %2 : vector<16x128xf32>
    %4 = vector.shape_cast %3 : vector<16x128xf32> to vector<2x8x128xf32>
    %cst = arith.constant dense<0.000000e+00> : vector<8x128xf32>
    %5 = vector.multi_reduction <add>, %4, %cst [0] : vector<2x8x128xf32> to vector<8x128xf32>
    %c0_3 = arith.constant 0 : index
    %c0_4 = arith.constant 0 : index
    %6 = vector.load %arg3[%c0_3, %c0_4] : memref<8x128xf32, #tpu.memory_space<vmem>>, vector<8x128xf32>
    tpu.vector_store %arg3[%c0_3, %c0_4], %5 {strides = array<i32>} : memref<8x128xf32, #tpu.memory_space<vmem>>, vector<8x128xf32>,
    return
  }
  func.func @transform_0(%arg0: i32) -> (i32, i32) {
    %c0_i32 = arith.constant 0 : i32
    %c0_i32_0 = arith.constant 0 : i32
    return %arg0, %c0_i32 : i32, i32
  }
  func.func @transform_1(%arg0: i32) -> (i32, i32) {
    %c0_i32 = arith.constant 0 : i32
    %c0_i32_0 = arith.constant 0 : i32
    return %arg0, %c0_i32 : i32, i32
  }
  func.func @transform_2(%arg0: i32) -> (i32, i32) {
    %c0_i32 = arith.constant 0 : i32
    %c0_i32_0 = arith.constant 0 : i32
    return %arg0, %c0_i32 : i32, i32
  }
}

</mosaic_0001>

<bundles_post_ra>
// kernel: tpu_custom_call.1
= control target key start
LH: loop header
LB: loop body
LE: loop exit
PB: predicated region body
PF: predicated region fallthrough
CT: control target
= control target key end

     0   :  { %7 = vsyncpa [#allocation3], 0  ;;  %s199_s0 = inlined_call_operand.hbm [shape: f32[16,128], index: 0, kind: input, shape index: {}]   ;;  %s200_s1 = inlined_call_operand.hbm [shape: f32[16,128], index: 1, kind: input, shape index: {}]   ;;  %s201_s2 = inlined_call_operand.hbm [shape: f32[8,128], index: 2, kind: output, shape index: {}]  }
   0x1   :  { %8 = vsyncpa [#allocation6], 0 }
   0x2   :  { %9 = vsyncpa [#allocation4], 0  ;;  %s143_s9 = smov [#allocation2]   ;;  %s71_s13 = scalar_lea.hbm %s199_s0, 256 }
   0x3   :  { %s15_s10 = sshll.u32 %s143_s9, 4  ;;  %p72_p0 = scmp.ne.s32.totalorder %s199_s0, %s71_s13  ;;  %s16_s10 = int_to_ptr.vmem [resolvable:$true] %s15_s10 }
   0x4   :  { %p75_p1 = scmp.lt.u32.totalorder %s71_s13, %s199_s0 }
   0x6   :  { %p77_p2 = pnand %p75_p1, %p72_p0 }
   0x8   :  { %80 = shalt.err (!%p77_p2)
}
   0x9   :  { %s81_s18 = scalar_lea.vmem %s16_s10, 256  ;;  %p86_p4 = scmp.lt.s32.totalorder %s16_s10, %s16_s10 }
   0xa   :  { %p82_p3 = scmp.ne.s32.totalorder %s16_s10, %s81_s18  ;;  %p87_p5 = scmp.lt.s32.totalorder %s81_s18, %s81_s18 }
   0xc   :  { %p88_p6 = por %p87_p5, %p86_p4 }
   0xe   :  { %p89_p7 = pnand %p88_p6, %p82_p3 }
  0x10   :  { %92 = shalt.err (!%p89_p7)
}
  0x11   :  { %s144_s19 = smov 128   ;;  %s145_s20 = smov 8  }
  0x12   :  { %21 = dma.hbm_to_vmem [thread:$0]  %s199_s0, 256, %s16_s10, [#allocation3], %s144_s19, %s144_s19, %s145_s20  }
  0x13   :  { %s146_s23 = smov [#allocation5]   ;;  %s93_s27 = scalar_lea.hbm %s200_s1, 256 }
  0x14   :  { %s27_s24 = sshll.u32 %s146_s23, 4  ;;  %p94_p8 = scmp.ne.s32.totalorder %s200_s1, %s93_s27  ;;  %s28_s24 = int_to_ptr.vmem [resolvable:$true] %s27_s24 }
  0x15   :  { %p97_p9 = scmp.lt.u32.totalorder %s93_s27, %s200_s1 }
  0x17   :  { %p99_p10 = pnand %p97_p9, %p94_p8 }
  0x19   :  { %102 = shalt.err (!%p99_p10)
}
  0x1a   :  { %s103_s4 = scalar_lea.vmem %s28_s24, 256  ;;  %p108_p12 = scmp.lt.s32.totalorder %s28_s24, %s28_s24 }
  0x1b   :  { %p104_p11 = scmp.ne.s32.totalorder %s28_s24, %s103_s4  ;;  %p109_p13 = scmp.lt.s32.totalorder %s103_s4, %s103_s4 }
  0x1d   :  { %p110_p0 = por %p109_p13, %p108_p12 }
  0x1f   :  { %p111_p1 = pnand %p110_p0, %p104_p11 }
  0x21   :  { %114 = shalt.err (!%p111_p1)
}
  0x22   :  { %33 = dma.hbm_to_vmem [thread:$0]  %s200_s1, 256, %s28_s24, [#allocation6], %s144_s19, %s144_s19, %s145_s20  }
  0x23   :  { %137 = dma.done.wait [#allocation3], 256  }
  0x24   :  { %138 = vsyncadd [#allocation3], 4294967040 }
  0x25   :  { %139 = dma.done.wait [#allocation6], 256  }
  0x26   :  { %140 = vsyncadd [#allocation6], 4294967040  ;;  %v40_v0 = vld [vmem:[#allocation2] sm:$0xff]  ;;  %v41_v1 = vld [vmem:[#allocation2 + $0x8] sm:$0xff]  ;;  %s147_s6 = smov [#allocation7]  }
  0x27   :  { %v42_v2 = vld [vmem:[#allocation5] sm:$0xff]  ;;  %v43_v3 = vld [vmem:[#allocation5 + $0x8] sm:$0xff]  ;;  %s56_s7 = sshll.u32 %s147_s6, 4  ;;  %s57_s7 = int_to_ptr.vmem [resolvable:$true] %s56_s7 }
  0x28   :  { %v44_v4 = vsub.f32 %v40_v0, %v42_v2  ;;  %v45_v5 = vsub.f32 %v41_v1, %v43_v3  ;;  %s115_s8 = scalar_lea.vmem %s57_s7, 128  ;;  %p120_p3 = scmp.lt.s32.totalorder %s57_s7, %s57_s7 }
  0x29   :  { %p116_p2 = scmp.ne.s32.totalorder %s57_s7, %s115_s8  ;;  %p121_p4 = scmp.lt.s32.totalorder %s115_s8, %s115_s8 }
  0x2a   :  { %v46_v6 = vmul.f32 %v44_v4, %v44_v4  ;;  %v47_v7 = vmul.f32 %v45_v5, %v45_v5 }
  0x2b   :  { %p122_p5 = por %p121_p4, %p120_p3 }
  0x2c   :  { %v48_v8 = vadd.f32 %v47_v7, %v46_v6 }
  0x2d   :  { %p123_p6 = pnand %p122_p5, %p116_p2 }
  0x2e   :  { %49 = vst [vmem:[#allocation7] sm:$0xff] %v48_v8 }
  0x2f   :  { %126 = shalt.err (!%p123_p6)
}
  0x30   :  { %s127_s10 = scalar_lea.hbm %s201_s2, 128 }
  0x31   :  { %p128_p7 = scmp.ne.s32.totalorder %s201_s2, %s127_s10  ;;  %p131_p8 = scmp.lt.u32.totalorder %s127_s10, %s201_s2 }
  0x33   :  { %p133_p9 = pnand %p131_p8, %p128_p7 }
  0x35   :  { %136 = shalt.err (!%p133_p9)
}
  0x36   :  { %59 = dma.vmem_to_hbm [thread:$0]  %s57_s7, 128, %s201_s2, [#allocation4]  }
  0x37   :  { %141 = dma.done.wait [#allocation4], 128  }
  0x38   :  { %142 = vsyncadd [#allocation4], 4294967168 }
  0x39   :  { %63 = vsyncpa [#allocation3], 1 }
  0x3a   :  { %64 = vsyncpa [#allocation6], 1 }
  0x3b   :  { %65 = vsyncpa [#allocation4], 1 }

</bundles_post_ra>
